<compile_context>
chip_gen: v7x
topology: tpu7x:2x2x1
jax: 0.10.0
libtpu: 0.0.40
codegen_flags: <defaults>
</compile_context>

<pallas_src>
import functools

import jax
import jax.numpy as jnp
from jax.experimental import pallas as pl
from jax.experimental.pallas import tpu as pltpu

# Synthetic stand-in for utils.N_EFP (number of energy-flow-polynomial features)
N_EFP = 64
LATENT_SIZE = 32
DEFAULT_TM = 4096         # batch-tile rows per grid step (HBM-streaming regime)


def _round_up(n, m):
    return (n + m - 1) // m * m


def encoder_kernel(x_ref, w_ref, b_ref, o_ref):
    # x:(TM, N_EFP) f32   w:(N_EFP, LATENT_SIZE) bf16 (pre-transposed, resident)
    # b:(1, LATENT_SIZE) f32                     o:(TM, LATENT_SIZE) f32
    x = x_ref[...].astype(jnp.bfloat16)          # cast hides under the input DMA
    y = jnp.dot(x, w_ref[...], preferred_element_type=jnp.float32)
    y = y + b_ref[...]
    # sigmoid(y) = 1 / (1 + exp(-y)); exp -> EUP, approx reciprocal -> EUP,
    # keeps the VALU free.  Epilogue is only 32 lanes wide now.
    e = jnp.exp(-y)
    o_ref[...] = pl.reciprocal(1.0 + e, approx=True).astype(o_ref.dtype)


def _choose_tm(batch, tm):
    """Pick a batch tile: big for streaming, but >=2 grid steps when possible
    (so the 'parallel' axis can shard across v7x's two TensorCores)."""
    if batch > tm:
        return tm                                   # many steps anyway
    half = -(-batch // 2)                           # cdiv(batch, 2)
    tm_eff = _round_up(half, 8)                     # sublane-aligned block rows
    if tm_eff >= batch:
        # batch too small to split into 8-aligned halves -> single full block
        # (block rows == full array dim is always a legal block shape).
        return batch
    return tm_eff


@functools.partial(jax.jit, static_argnames=("tm",))
def encoder_forward(x, w, b, *, tm=DEFAULT_TM):
    """Forward pass of Encoder.

    x: (B, N_EFP) float; w: (LATENT_SIZE, N_EFP) (PyTorch nn.Linear layout);
    b: (LATENT_SIZE,). Returns (B, LATENT_SIZE) float32.
    """
    B = x.shape[0]

    # ---- one-time parameter relayout (tiny, fused under jit) ---------------
    w_t = w.T.astype(jnp.bfloat16)                       # (N_EFP, LATENT_SIZE)
    b_p = b.astype(jnp.float32).reshape(1, LATENT_SIZE)  # (1, LATENT_SIZE)

    x_f = x.astype(jnp.float32)                          # no standalone bf16 pass

    tm_eff = _choose_tm(B, tm)
    grid = (pl.cdiv(B, tm_eff),)                         # partial last block OK

    out = pl.pallas_call(
        encoder_kernel,
        out_shape=jax.ShapeDtypeStruct((B, LATENT_SIZE), jnp.float32),
        grid=grid,
        in_specs=[
            pl.BlockSpec((tm_eff, N_EFP), lambda i: (i, 0)),       # x streams
            pl.BlockSpec((N_EFP, LATENT_SIZE), lambda i: (0, 0)),  # W resident
            pl.BlockSpec((1, LATENT_SIZE), lambda i: (0, 0)),      # bias resident
        ],
        out_specs=pl.BlockSpec((tm_eff, LATENT_SIZE), lambda i: (i, 0)),
        compiler_params=pltpu.CompilerParams(
            dimension_semantics=("parallel",)),
    )(x_f, w_t, b_p)

    return out


if __name__ == "__main__":
    key = jax.random.PRNGKey(0)
    kx, kw, kb = jax.random.split(key, 3)

    # Non-multiple-of-tile batch: exercises the partial-last-block path and a
    # multi-step (2-step) grid while staying small.
    B = 300
    bound = 1.0 / jnp.sqrt(N_EFP)
    w = jax.random.uniform(kw, (LATENT_SIZE, N_EFP), jnp.float32, -bound, bound)
    b = jax.random.uniform(kb, (LATENT_SIZE,), jnp.float32, -bound, bound)
    x = jax.random.normal(kx, (B, N_EFP), jnp.float32)

    out = encoder_forward(x, w, b)
    jax.block_until_ready(out)

    # Reference in plain JAX (inputs cast to bf16 to match the kernel's cast).
    xb = x.astype(jnp.bfloat16).astype(jnp.float32)
    wb = w.astype(jnp.bfloat16).astype(jnp.float32)
    ref = jax.nn.sigmoid(xb @ wb.T + b)

    assert out.shape == (B, LATENT_SIZE)
    assert out.dtype == jnp.float32
    err = float(jnp.max(jnp.abs(out - ref)))
    assert jnp.allclose(out, ref, atol=5e-3, rtol=5e-3), f"max abs err = {err}"

    print("KERNEL_OK")
</pallas_src>

<mosaic_0001>
module attributes {stable_mosaic.version = 11 : i64} {
  func.func @encoder_kernel(%arg0: i32, %arg1: memref<152x64xf32, #tpu.memory_space<vmem>>, %arg2: memref<64x32xbf16, #tpu.memory_space<vmem>>, %arg3: memref<1x32xf32, #tpu.memory_space<vmem>>, %arg4: memref<152x32xf32, #tpu.memory_space<vmem>>) attributes {dimension_semantics = [#tpu.dimension_semantics<parallel>], iteration_bounds = array<i64: 2>, scalar_prefetch = 0 : i64, scratch_operands = 0 : i64, tpu.core_type = #tpu.core_type<tc>, window_params = [{transform_indices = @transform_0, window_bounds = array<i64: 152, 64>}, {pipeline_mode = #tpu.pipeline_mode<synchronous>, transform_indices = @transform_1, window_bounds = array<i64: 64, 32>}, {pipeline_mode = #tpu.pipeline_mode<synchronous>, transform_indices = @transform_2, window_bounds = array<i64: 1, 32>}, {transform_indices = @transform_3, window_bounds = array<i64: 152, 32>}]} {
    %c0 = arith.constant 0 : index
    %c0_0 = arith.constant 0 : index
    %0 = vector.load %arg1[%c0, %c0_0] : memref<152x64xf32, #tpu.memory_space<vmem>>, vector<152x64xf32>
    %1 = arith.truncf %0 : vector<152x64xf32> to vector<152x64xbf16>
    %c0_1 = arith.constant 0 : index
    %c0_2 = arith.constant 0 : index
    %2 = vector.load %arg2[%c0_1, %c0_2] : memref<64x32xbf16, #tpu.memory_space<vmem>>, vector<64x32xbf16>
    %cst = arith.constant dense<0.000000e+00> : vector<152x32xf32>
    %3 = tpu.matmul %1, %2, %cst {dimension_numbers = #tpu.dot_dimension_numbers<[1], [0], [0], [1], [0, 0, 1, 1], [], []>} : vector<152x64xbf16>, vector<64x32xbf16>, vector<152x32xf32> -> vector<152x32xf32>
    %c0_3 = arith.constant 0 : index
    %c0_4 = arith.constant 0 : index
    %4 = vector.load %arg3[%c0_3, %c0_4] : memref<1x32xf32, #tpu.memory_space<vmem>>, vector<1x32xf32>
    %5 = vector.broadcast %4 : vector<1x32xf32> to vector<152x32xf32>
    %6 = arith.addf %3, %5 : vector<152x32xf32>
    %cst_5 = arith.constant 0.000000e+00 : f32
    %7 = vector.broadcast %cst_5 : f32 to vector<152x32xf32>
    %8 = arith.subf %7, %6 : vector<152x32xf32>
    %9 = math.exp %8 : vector<152x32xf32>
    %cst_6 = arith.constant 1.000000e+00 : f32
    %10 = vector.broadcast %cst_6 : f32 to vector<152x32xf32>
    %11 = arith.addf %10, %9 : vector<152x32xf32>
    %12 = tpu.reciprocal %11 {approx = true} : vector<152x32xf32> -> vector<152x32xf32>
    %c0_7 = arith.constant 0 : index
    %c0_8 = arith.constant 0 : index
    %13 = vector.load %arg4[%c0_7, %c0_8] : memref<152x32xf32, #tpu.memory_space<vmem>>, vector<152x32xf32>
    tpu.vector_store %arg4[%c0_7, %c0_8], %12 {strides = array<i32>} : memref<152x32xf32, #tpu.memory_space<vmem>>, vector<152x32xf32>,
    return
  }
  func.func @transform_0(%arg0: i32) -> (i32, i32) {
    %c0_i32 = arith.constant 0 : i32
    %c0_i32_0 = arith.constant 0 : i32
    return %arg0, %c0_i32 : i32, i32
  }
  func.func @transform_1(%arg0: i32) -> (i32, i32) {
    %c0_i32 = arith.constant 0 : i32
    %c0_i32_0 = arith.constant 0 : i32
    %c0_i32_1 = arith.constant 0 : i32
    return %c0_i32, %c0_i32_0 : i32, i32
  }
  func.func @transform_2(%arg0: i32) -> (i32, i32) {
    %c0_i32 = arith.constant 0 : i32
    %c0_i32_0 = arith.constant 0 : i32
    %c0_i32_1 = arith.constant 0 : i32
    return %c0_i32, %c0_i32_0 : i32, i32
  }
  func.func @transform_3(%arg0: i32) -> (i32, i32) {
    %c0_i32 = arith.constant 0 : i32
    %c0_i32_0 = arith.constant 0 : i32
    return %arg0, %c0_i32 : i32, i32
  }
}

</mosaic_0001>

<bundles_post_ra>
// kernel: encoder_forward.1
= control target key start
LH: loop header
LB: loop body
LE: loop exit
PB: predicated region body
PF: predicated region fallthrough
CT: control target
= control target key end

     0   :  { %s747_s12 = smov 0   ;;  %s878_s0 = inlined_call_operand.vmem [shape: f32[300,64], index: 0, kind: input, shape index: {}]   ;;  %s879_s1 = inlined_call_operand.vmem [shape: bf16[64,32], index: 1, kind: input, shape index: {}]   ;;  %s880_s2 = inlined_call_operand.vmem [shape: f32[1,32], index: 2, kind: input, shape index: {}]   ;;  %s881_s3 = inlined_call_operand.vmem [shape: f32[300,32], index: 3, kind: output, shape index: {}]  }
   0x1 LB: > { %s557_s13 = sadd.s32 4294967295, %s725_s12   ;;  %p561_p0 = scmp.ge.s32.totalorder %s725_s12, 1  ;;  %s725_s12 = sphi %s747_s12, %s13_s12  }
   0x2   : > { %p138_p1 = scmp.lt.s32.totalorder %s725_s12, 3 }
   0x4   : > { %p139_p2 = pnand %p561_p0, %p138_p1 }
   0x5   : > { %v639_v0 = vld [vmem:[%s879_s1] sm:$0xff] (!%p139_p2)   ;;  %s162_s16 = smul.u32 (!%p139_p2), 19, %s557_s13  ;;  %v640_v1 = vld [vmem:[%s879_s1 + $0x8] sm:$0xff] (!%p139_p2)   ;;  %v641_v2 = vld [vmem:[%s879_s1 + $0x10] sm:$0xff] (!%p139_p2)   ;;  %vm243_vm0 = vcmask (!%p139_p2), 523264   ;;  %vm481_vm1 = vcmask (!%p139_p2), 261120  }
   0x6   : > { %142 = sbr.rel (%p139_p2) target bundleno = 296 (0x128), region = 32  ;;  %595 = vmatprep.subr.bf16.mxu0 (!%p139_p2), %v639_v0  ;;  %623 = vmatprep.subr.bf16.mxu1 (!%p139_p2), %v639_v0  ;;  %v642_v3 = vld [vmem:[%s879_s1 + $0x18] sm:$0xff] (!%p139_p2)   ;;  %v809_v33 = vld [vmem:[%s880_s2] ss:$0 sm:$0xff] (!%p139_p2) }
   0x7   : > { %p163_p3 = scmp.lt.s32.totalorder (!%p139_p2), %s162_s16, 37  ;;  %596 = vmatpush3.bf16.msra.mxu0 (!%p139_p2), %v639_v0  ;;  %627 = vmatpush3.bf16.msra.mxu1 (!%p139_p2), %v639_v0 }
   0x8   : > { %597 = vmatprep.subr.bf16.mxu0 (!%p139_p2), %v640_v1  ;;  %624 = vmatprep.subr.bf16.mxu1 (!%p139_p2), %v640_v1 }
   0xb   : > { %598 = vmatpush3.bf16.msra.mxu0 (!%p139_p2), %v640_v1  ;;  %628 = vmatpush3.bf16.msra.mxu1 (!%p139_p2), %v640_v1 }
   0xc   : > { %599 = vmatprep.subr.bf16.mxu0 (!%p139_p2), %v641_v2  ;;  %625 = vmatprep.subr.bf16.mxu1 (!%p139_p2), %v641_v2 }
   0xd   : > { %s883_s16 = smov (!%p163_p3, %s162_s16), 37 }
   0xe   : > { %s562_s21 = sshll.u32 %s883_s16, 3 }
   0xf   : > { %s772_s24 = scalar_lea.vmem %s878_s0, %s562_s21  ;;  %600 = vmatpush3.bf16.msra.mxu0 %v641_v2  ;;  %629 = vmatpush3.bf16.msra.mxu1 %v641_v2  ;;  %s835_s4 = scalar_lea.vmem %s881_s3, %s562_s21 }
  0x10   : > { %v175_v4 = vld [vmem:[%s772_s24] sm:$0xff]  ;;  %v176_v5 = vld [vmem:[%s772_s24 + $0x8] sm:$0xff]  ;;  %v177_v9 = vld [vmem:[%s772_s24 + $0x10] sm:$0xff]  ;;  %601 = vmatprep.subr.bf16.mxu0 %v642_v3  ;;  %626 = vmatprep.subr.bf16.mxu1 %v642_v3 }
  0x11   : > { %v194_v6 = vpack.c.bf16 %v176_v5, %v175_v4  ;;  %v187_v7 = vld [vmem:[%s772_s24 + $0x60] sm:$0xff]  ;;  %v188_v8 = vld [vmem:[%s772_s24 + $0x68] sm:$0xff]  ;;  %v178_v10 = vld [vmem:[%s772_s24 + $0x18] sm:$0xff] }
  0x12   : > { %v200_v11 = vpack.c.bf16 %v188_v8, %v187_v7  ;;  %v189_v12 = vld [vmem:[%s772_s24 + $0x70] sm:$0xff]  ;;  %v190_v13 = vld [vmem:[%s772_s24 + $0x78] sm:$0xff]  ;;  %v179_v14 = vld [vmem:[%s772_s24 + $0x20] sm:$0xff]  ;;  %v195_v18 = vpack.c.bf16 %v178_v10, %v177_v9 }
  0x13   : > { %603 = vmatprep.mubr.msk.bf16.mxu0 %vm243_vm0, %v194_v6  ;;  %v180_v15 = vld [vmem:[%s772_s24 + $0x28] sm:$0xff]  ;;  %v191_v16 = vld [vmem:[%s772_s24 + $0x80] sm:$0xff]  ;;  %v201_v19 = vpack.c.bf16 %v190_v13, %v189_v12  ;;  %602 = vmatpush3.bf16.msra.mxu0 %v642_v3  ;;  %v181_v22 = vld [vmem:[%s772_s24 + $0x30] sm:$0xff] }
  0x14   : > { %v192_v17 = vld [vmem:[%s772_s24 + $0x88] sm:$0xff]  ;;  %615 = vmatprep.mubr.msk.bf16.mxu1 %vm243_vm0, %v200_v11  ;;  %630 = vmatpush3.bf16.msra.mxu1 %v642_v3  ;;  %v196_v20 = vpack.c.bf16 %v180_v15, %v179_v14  ;;  %v182_v23 = vld [vmem:[%s772_s24 + $0x38] sm:$0xff]  ;;  %v193_v24 = vld [vmem:[%s772_s24 + $0x90] sm:$0xff] }
  0x15   : > { %v202_v21 = vpack.c.bf16 %v192_v17, %v191_v16  ;;  %v183_v25 = vld [vmem:[%s772_s24 + $0x40] sm:$0xff]  ;;  %v184_v26 = vld [vmem:[%s772_s24 + $0x48] sm:$0xff]  ;;  %v197_v27 = vpack.c.bf16 %v182_v23, %v181_v22  ;;  %v203_v28 = vpack.c.bf16 %v193_v24, %v193_v24  ;;  %v185_v30 = vld [vmem:[%s772_s24 + $0x50] sm:$0xff] }
  0x16   : > { %604 = vmatmul.mubr.msk.bf16.vlgmr.msra.gmra.mrb[0].mxu0 %vm243_vm0, %v195_v18  ;;  %v198_v29 = vpack.c.bf16 %v184_v26, %v183_v25  ;;  %v186_v31 = vld [vmem:[%s772_s24 + $0x58] sm:$0xff] }
  0x17   : > { %616 = vmatmul.mubr.msk.bf16.vlgmr.msra.gmra.mrb[0].mxu1 %vm243_vm0, %v201_v19  ;;  %607 = vmatprep.mubr.msk.bf16.mxu0 %vm243_vm0, %v196_v20  ;;  %v199_v32 = vpack.c.bf16 %v186_v31, %v185_v30 }
  0x18   : > { %619 = vmatprep.mubr.msk.bf16.mxu1 %vm243_vm0, %v202_v21 }
  0x1e   : > { %608 = vmatmul.mubr.msk.bf16.gmra.mrb[4].mxu0 %vm243_vm0, %v197_v27 }
  0x1f   : > { %620 = vmatmul.mubr.msk.bf16.gmra.mrb[4].mxu1 %vm243_vm0, %v203_v28  ;;  %611 = vmatprep.mubr.msk.bf16.mxu0 %vm243_vm0, %v198_v29 }
  0x26   : > { %612 = vmatmul.mubr.msk.bf16.gmra.mrb[8].mxu0 %vm243_vm0, %v199_v32 }
  0xe9   : > { %v605_v34 = vpop.f32.mrb[0].mxu0 }
  0xea   : > { %v617_v35 = vpop.f32.mrb[0].mxu1  ;;  %v317_v36 = vadd.f32 %v605_v34, %v809_v33  ;;  %v308_v37 = vpop.f32.mrb[1].mxu0 }
  0xeb   : > { %v365_v38 = vadd.f32 %v617_v35, %v809_v33  ;;  %v356_v39 = vpop.f32.mrb[1].mxu1  ;;  %v309_v40 = vadd.f32 %v809_v33, %v308_v37  ;;  %v606_v41 = vpop.f32.mrb[2].mxu0 }
  0xec   : > { %v357_v42 = vadd.f32 %v809_v33, %v356_v39  ;;  %v618_v43 = vpop.f32.mrb[2].mxu1  ;;  %v388_v44 = vsub.f32 0.0, %v317_v36  ;;  %v320_v45 = vadd.f32 %v606_v41, %v809_v33  ;;  %v311_v46 = vpop.f32.mrb[3].mxu0 }
  0xed   : > { %v400_v47 = vsub.f32 0.0, %v365_v38  ;;  %v368_v48 = vadd.f32 %v618_v43, %v809_v33  ;;  %v359_v49 = vpop.f32.mrb[3].mxu1  ;;  %v386_v50 = vsub.f32 0.0, %v309_v40  ;;  %v312_v51 = vadd.f32 %v809_v33, %v311_v46 }
  0xee   : > { %v398_v52 = vsub.f32 0.0, %v357_v42  ;;  %v360_v53 = vadd.f32 %v809_v33, %v359_v49  ;;  %v409_v54 = vmul.f32 1.442695, %v388_v44  ;;  %v389_v55 = vsub.f32 0.0, %v320_v45 }
  0xef   : > { %v401_v56 = vsub.f32 0.0, %v368_v48  ;;  %v405_v57 = vmul.f32 1.442695, %v386_v50  ;;  %v387_v58 = vsub.f32 0.0, %v312_v51  ;;  %v433_v61 = vmul.f32 1.442695, %v400_v47 }
  0xf0   : > { %v399_v59 = vsub.f32 0.0, %v360_v53  ;;  %643 = vpow2.f32 %v409_v54  ;;  %v411_v60 = vmul.f32 1.442695, %v389_v55  ;;  %v429_v63 = vmul.f32 1.442695, %v398_v52 }
  0xf1   : > { %645 = vpow2.f32 %v405_v57  ;;  %v407_v62 = vmul.f32 1.442695, %v387_v58  ;;  %v609_v0 = vpop.f32.mrb[4].mxu0  ;;  %v435_v2 = vmul.f32 1.442695, %v401_v56 }
  0xf2   : > { %v621_v1 = vpop.f32.mrb[4].mxu1  ;;  %647 = vpow2.f32 %v411_v60  ;;  %v333_v3 = vadd.f32 %v609_v0, %v809_v33  ;;  %v324_v4 = vpop.f32.mrb[5].mxu0  ;;  %v431_v7 = vmul.f32 1.442695, %v399_v59 }
  0xf3   : > { %v381_v5 = vadd.f32 %v621_v1, %v809_v33  ;;  %v372_v6 = vpop.f32.mrb[5].mxu1  ;;  %649 = vpow2.f32 %v407_v62  ;;  %v325_v8 = vadd.f32 %v809_v33, %v324_v4  ;;  %v610_v9 = vpop.f32.mrb[6].mxu0 }
  0xf4   : > { %v622_v10 = vpop.f32.mrb[6].mxu1  ;;  %651 = vpow2.f32 %v433_v61  ;;  %v392_v11 = vsub.f32 0.0, %v333_v3  ;;  %v336_v12 = vadd.f32 %v610_v9, %v809_v33  ;;  %v327_v13 = vpop.f32.mrb[7].mxu0  ;;  %v373_v39 = vadd.f32 %v809_v33, %v372_v6 }
  0xf5   : > { %v404_v14 = vsub.f32 0.0, %v381_v5  ;;  %v375_v15 = vpop.f32.mrb[7].mxu1  ;;  %653 = vpow2.f32 %v429_v63  ;;  %v390_v16 = vsub.f32 0.0, %v325_v8  ;;  %v328_v17 = vadd.f32 %v809_v33, %v327_v13 }
  0xf6   : > { %655 = vpow2.f32 %v435_v2  ;;  %v417_v18 = vmul.f32 1.442695, %v392_v11  ;;  %v393_v19 = vsub.f32 0.0, %v336_v12  ;;  %v376_v45 = vadd.f32 %v809_v33, %v375_v15 }
  0xf7   : > { %657 = vpow2.f32 %v431_v7  ;;  %v413_v20 = vmul.f32 1.442695, %v390_v16  ;;  %v391_v21 = vsub.f32 0.0, %v328_v17  ;;  %v441_v23 = vmul.f32 1.442695, %v404_v14 }
  0xf8   : > { %659 = vpow2.f32 %v417_v18  ;;  %v419_v22 = vmul.f32 1.442695, %v393_v19  ;;  %v402_v51 = vsub.f32 0.0, %v373_v39  ;;  %v403_v59 = vsub.f32 0.0, %v376_v45 }
  0xf9   : > { %661 = vpow2.f32 %v413_v20  ;;  %v415_v24 = vmul.f32 1.442695, %v391_v21  ;;  %v613_v25 = vpop.f32.mrb[8].mxu0 }
  0xfa   : > { %v644_v26 = vpop.eup %643  ;;  %663 = vpow2.f32 %v419_v22  ;;  %v340_v27 = vpop.f32.mrb[9].mxu0  ;;  %v349_v42 = vadd.f32 %v613_v25, %v809_v33  ;;  %v437_v0 = vmul.f32 1.442695, %v402_v51  ;;  %v439_v7 = vmul.f32 1.442695, %v403_v59 }
  0xfb   : > { %v646_v28 = vpop.eup %645  ;;  %v445_v29 = vadd.f32 1.0, %v644_v26  ;;  %665 = vpow2.f32 %v415_v24  ;;  %v614_v30 = vpop.f32.mrb[10].mxu0  ;;  %v341_v48 = vadd.f32 %v809_v33, %v340_v27 }
  0xfc   : > { %v648_v31 = vpop.eup %647  ;;  %v443_v32 = vadd.f32 1.0, %v646_v28  ;;  %667 = vpow2.f32 %v441_v23  ;;  %v343_v34 = vpop.f32.mrb[11].mxu0  ;;  %v352_v52 = vadd.f32 %v614_v30, %v809_v33  ;;  %v396_v55 = vsub.f32 0.0, %v349_v42 }
  0xfd   : > { %v650_v35 = vpop.eup %649  ;;  %669 = vrcp.f32 %v445_v29  ;;  %v446_v36 = vadd.f32 1.0, %v648_v31  ;;  %v344_v56 = vadd.f32 %v809_v33, %v343_v34  ;;  %v394_v62 = vsub.f32 0.0, %v341_v48 }
  0xfe   : > { %v652_v37 = vpop.eup %651  ;;  %671 = vrcp.f32 %v443_v32  ;;  %v444_v38 = vadd.f32 1.0, %v650_v35  ;;  %v397_v1 = vsub.f32 0.0, %v352_v52  ;;  %v425_v4 = vmul.f32 1.442695, %v396_v55 }
  0xff   : > { %v654_v40 = vpop.eup %653  ;;  %673 = vrcp.f32 %v446_v36  ;;  %v457_v41 = vadd.f32 1.0, %v652_v37  ;;  %v395_v5 = vsub.f32 0.0, %v344_v56  ;;  %v421_v9 = vmul.f32 1.442695, %v394_v62 }
 0x100   : > { %v656_v43 = vpop.eup %655  ;;  %675 = vrcp.f32 %v444_v38  ;;  %v455_v44 = vadd.f32 1.0, %v654_v40  ;;  %v427_v11 = vmul.f32 1.442695, %v397_v1 }
 0x101   : > { %v658_v46 = vpop.eup %657  ;;  %677 = vrcp.f32 %v457_v41  ;;  %v458_v47 = vadd.f32 1.0, %v656_v43  ;;  %v423_v13 = vmul.f32 1.442695, %v395_v5 }
 0x102   : > { %v660_v49 = vpop.eup %659  ;;  %679 = vrcp.f32 %v455_v44  ;;  %v456_v50 = vadd.f32 1.0, %v658_v46 }
 0x103   : > { %v662_v53 = vpop.eup %661  ;;  %681 = vrcp.f32 %v458_v47  ;;  %v449_v54 = vadd.f32 1.0, %v660_v49 }
 0x104   : > { %v664_v57 = vpop.eup %663  ;;  %683 = vrcp.f32 %v456_v50  ;;  %v447_v58 = vadd.f32 1.0, %v662_v53 }
 0x105   : > { %v666_v60 = vpop.eup %665  ;;  %685 = vrcp.f32 %v449_v54  ;;  %v450_v61 = vadd.f32 1.0, %v664_v57 }
 0x106   : > { %v668_v63 = vpop.eup %667  ;;  %687 = vrcp.f32 %v447_v58  ;;  %v448_v33 = vadd.f32 1.0, %v666_v60 }
 0x107   : > { %v670_v2 = vpop.eup %669  ;;  %689 = vrcp.f32 %v450_v61  ;;  %v461_v3 = vadd.f32 1.0, %v668_v63 }
 0x108   : > { %v672_v6 = vpop.eup %671  ;;  %484 = vst.msk [vmem:[%s835_s4 + $0x10] sm:$0xff] %vm481_vm1, %v670_v2  ;;  %691 = vrcp.f32 %v448_v33 }
 0x109   : > { %v674_v8 = vpop.eup %673  ;;  %482 = vst.msk [vmem:[%s835_s4] sm:$0xff] %vm481_vm1, %v672_v6  ;;  %693 = vrcp.f32 %v461_v3 }
 0x10a   : > { %v676_v10 = vpop.eup %675  ;;  %485 = vst.msk [vmem:[%s835_s4 + $0x18] sm:$0xff] %vm481_vm1, %v674_v8  ;;  %695 = vpow2.f32 %v437_v0 }
 0x10b   : > { %v678_v12 = vpop.eup %677  ;;  %483 = vst.msk [vmem:[%s835_s4 + $0x8] sm:$0xff] %vm481_vm1, %v676_v10  ;;  %697 = vpow2.f32 %v425_v4 }
 0x10c   : > { %v680_v14 = vpop.eup %679  ;;  %496 = vst.msk [vmem:[%s835_s4 + $0x70] sm:$0xff] %vm481_vm1, %v678_v12  ;;  %699 = vpow2.f32 %v439_v7 }
 0x10d   : > { %v682_v15 = vpop.eup %681  ;;  %494 = vst.msk [vmem:[%s835_s4 + $0x60] sm:$0xff] %vm481_vm1, %v680_v14  ;;  %701 = vpow2.f32 %v421_v9 }
 0x10e   : > { %v684_v16 = vpop.eup %683  ;;  %497 = vst.msk [vmem:[%s835_s4 + $0x78] sm:$0xff] %vm481_vm1, %v682_v15  ;;  %703 = vpow2.f32 %v427_v11 }
 0x10f   : > { %v686_v17 = vpop.eup %685  ;;  %495 = vst.msk [vmem:[%s835_s4 + $0x68] sm:$0xff] %vm481_vm1, %v684_v16  ;;  %705 = vpow2.f32 %v423_v13 }
 0x110   : > { %v688_v18 = vpop.eup %687  ;;  %488 = vst.msk [vmem:[%s835_s4 + $0x30] sm:$0xff] %vm481_vm1, %v686_v17 }
 0x111   : > { %v690_v19 = vpop.eup %689  ;;  %486 = vst.msk [vmem:[%s835_s4 + $0x20] sm:$0xff] %vm481_vm1, %v688_v18 }
 0x112   : > { %v692_v20 = vpop.eup %691  ;;  %489 = vst.msk [vmem:[%s835_s4 + $0x38] sm:$0xff] %vm481_vm1, %v690_v19 }
 0x113   : > { %v694_v21 = vpop.eup %693  ;;  %487 = vst.msk [vmem:[%s835_s4 + $0x28] sm:$0xff] %vm481_vm1, %v692_v20 }
 0x114   : > { %v696_v22 = vpop.eup %695  ;;  %500 = vst.msk [vmem:[%s835_s4 + $0x90] sm:$0xff] %vm481_vm1, %v694_v21 }
 0x115   : > { %v698_v23 = vpop.eup %697  ;;  %v459_v24 = vadd.f32 1.0, %v696_v22 }
 0x116   : > { %v700_v25 = vpop.eup %699  ;;  %v453_v26 = vadd.f32 1.0, %v698_v23 }
 0x117   : > { %v702_v27 = vpop.eup %701  ;;  %707 = vrcp.f32 %v459_v24  ;;  %v460_v28 = vadd.f32 1.0, %v700_v25 }
 0x118   : > { %v704_v29 = vpop.eup %703  ;;  %709 = vrcp.f32 %v453_v26  ;;  %v451_v30 = vadd.f32 1.0, %v702_v27 }
 0x119   : > { %v706_v31 = vpop.eup %705  ;;  %711 = vrcp.f32 %v460_v28  ;;  %v454_v32 = vadd.f32 1.0, %v704_v29 }
 0x11a   : > { %713 = vrcp.f32 %v451_v30  ;;  %v452_v34 = vadd.f32 1.0, %v706_v31 }
 0x11b   : > { %715 = vrcp.f32 %v454_v32 }
 0x11c   : > { %717 = vrcp.f32 %v452_v34 }
 0x121   : > { %v708_v35 = vpop.eup %707 }
 0x122   : > { %v710_v36 = vpop.eup %709  ;;  %498 = vst.msk [vmem:[%s835_s4 + $0x80] sm:$0xff] %vm481_vm1, %v708_v35 }
 0x123   : > { %v712_v37 = vpop.eup %711  ;;  %492 = vst.msk [vmem:[%s835_s4 + $0x50] sm:$0xff] %vm481_vm1, %v710_v36 }
 0x124   : > { %v714_v38 = vpop.eup %713  ;;  %499 = vst.msk [vmem:[%s835_s4 + $0x88] sm:$0xff] %vm481_vm1, %v712_v37 }
 0x125   : > { %v716_v39 = vpop.eup %715  ;;  %490 = vst.msk [vmem:[%s835_s4 + $0x40] sm:$0xff] %vm481_vm1, %v714_v38 }
 0x126   : > { %v718_v40 = vpop.eup %717  ;;  %493 = vst.msk [vmem:[%s835_s4 + $0x58] sm:$0xff] %vm481_vm1, %v716_v39 }
 0x127   : > { %491 = vst.msk [vmem:[%s835_s4 + $0x48] sm:$0xff] %vm481_vm1, %v718_v40 }
 0x128 PF: > { %s13_s12 = sadd.s32 1, %s725_s12  }
 0x129   : > { %p10_p4 = scmp.ge.s32.totalorder %s13_s12, 4  }
 0x12b   :  { %12 = sbr.rel (!%p10_p4) target bundleno = 1 (0x1), region = 62 }

</bundles_post_ra>
